<compile_context>
chip_gen: v7x
topology: tpu7x:2x2x1
jax: 0.10.0
libtpu: 0.0.40
codegen_flags: <defaults>
</compile_context>

<pallas_src>
import math

import jax
import jax.numpy as jnp
from jax import lax
from jax.experimental import pallas as pl
from jax.experimental.pallas import tpu as pltpu

# ---- problem sizes (small, consistent with the module) ----------------------
N = 2            # batch
T = 8            # sequence length (power of two -> mask uses shifts, no int div)
E = 32           # embed_dim
HEADS = 4        # num_heads
HEAD_DIM = E // HEADS
NT = N * T       # batch*time folded into the sublane axis inside the kernel
GROUP = 128 // E # rows of attn_out packed per lane-dense slab row (=4)
_LOG2_T = T.bit_length() - 1

assert T & (T - 1) == 0, "T must be a power of two for the shift-based mask"
assert 128 % E == 0 and NT % GROUP == 0 and (NT // GROUP) * E == 128

_NEG_BIG = -1e30   # finite "-inf" (exp underflows to exactly 0, no NaN risk)


def _mha_kernel(qkv_ref, w_ref, out_ref, attnw_ref):
    """Single invocation; the whole problem (~25 KB) lives in VMEM."""
    q = qkv_ref[0]                                  # [NT, E]
    k = qkv_ref[1]
    v = qkv_ref[2]

    # Packed, pre-transposed weights: [E,4E] = [Wq^T*scale | Wk^T | Wv^T | Wo^T]
    wq = w_ref[:, 0:E]
    wk = w_ref[:, E:2 * E]
    wv = w_ref[:, 2 * E:3 * E]
    wo = w_ref[:, 3 * E:4 * E]

    # Input projections: three [NT,E]@[E,E] MXU matmuls (scale folded into Wq).
    qp = jnp.dot(q, wq, preferred_element_type=jnp.float32)
    kp = jnp.dot(k, wk, preferred_element_type=jnp.float32)
    vp = jnp.dot(v, wv, preferred_element_type=jnp.float32)

    # Batch is folded into rows, so per-head scores are one [NT,Dh]@[Dh,NT]
    # matmul; cross-batch pairs are masked together with the causal constraint.
    # Mask built once with iota + shifts (no HBM mask input, no integer div).
    ii = lax.broadcasted_iota(jnp.int32, (NT, NT), 0)
    jj = lax.broadcasted_iota(jnp.int32, (NT, NT), 1)
    keep = ((ii >> _LOG2_T) == (jj >> _LOG2_T)) & (jj <= ii)

    out_acc = jnp.zeros((NT, E), jnp.float32)
    attn_sum = jnp.zeros((NT, NT), jnp.float32)

    for h in range(HEADS):                          # static, fully unrolled
        lo = h * HEAD_DIM
        hi = lo + HEAD_DIM
        qh = qp[:, lo:hi]                           # [NT, Dh]
        kh = kp[:, lo:hi]
        vh = vp[:, lo:hi]

        # scores: q @ k^T without an explicit transpose (contract last dims)
        s = lax.dot_general(qh, kh, (((1,), (1,)), ((), ())),
                            preferred_element_type=jnp.float32)       # [NT,NT]
        s = jnp.where(keep, s, _NEG_BIG)

        m = jnp.max(s, axis=-1, keepdims=True)
        p = jnp.exp(s - m)                          # masked entries -> exactly 0
        inv = pl.reciprocal(jnp.sum(p, axis=-1, keepdims=True), approx=False)
        p = p * inv                                 # softmax (divide on EUP slot)
        attn_sum = attn_sum + p

        # cross-batch weights are exactly 0, so the folded matmul is correct
        ctx = jnp.dot(p, vh, preferred_element_type=jnp.float32)      # [NT,Dh]
        # accumulate output projection per head -> no concatenate / relayout
        out_acc = out_acc + jnp.dot(ctx, wo[lo:hi, :],
                                    preferred_element_type=jnp.float32)

    # Lane-dense attn_out store: pack GROUP(=4) consecutive output rows into one
    # 128-lane slab row (unmasked vst instead of 32-lane masked stores).
    out_slab = jnp.concatenate(
        [out_acc[g * GROUP:(g + 1) * GROUP, :] for g in range(NT // GROUP)],
        axis=1)                                      # [GROUP, 128]
    out_ref[...] = out_slab.astype(out_ref.dtype)

    # Head-averaged attention weights: only the per-batch diagonal blocks of the
    # folded [NT,NT] matrix are meaningful; emit them compactly as [T, N*T].
    blocks = [attn_sum[b * T:(b + 1) * T, b * T:(b + 1) * T] for b in range(N)]
    attnw_ref[...] = (jnp.concatenate(blocks, axis=1) *
                      (1.0 / HEADS)).astype(attnw_ref.dtype)


def mha_pallas(q, k, v, wq, wk, wv, wo):
    """q/k/v: [N, T, E]; wq/wk/wv/wo: PyTorch-style [out_features, in_features]."""
    n, t, e = q.shape
    assert (n, t, e) == (N, T, E)
    scale = 1.0 / math.sqrt(HEAD_DIM)

    # Host-side (free) prep: one stacked q/k/v stream and one lane-dense packed
    # weight slab (in a real model the weight packing is cached at load time).
    qkv = jnp.stack([q.reshape(NT, E), k.reshape(NT, E), v.reshape(NT, E)])
    w_pack = jnp.concatenate([(wq * scale).T, wk.T, wv.T, wo.T], axis=1)  # [E,4E]

    out_slab, attnw_slab = pl.pallas_call(
        _mha_kernel,
        out_shape=(
            jax.ShapeDtypeStruct((GROUP, (NT // GROUP) * E), q.dtype),   # (4,128)
            jax.ShapeDtypeStruct((T, N * T), jnp.float32),               # (8,16)
        ),
        grid_spec=pltpu.PrefetchScalarGridSpec(
            num_scalar_prefetch=0,
            grid=(1,),                                   # single invocation
            in_specs=[
                pl.BlockSpec((3, NT, E), lambda i: (0, 0, 0)),
                pl.BlockSpec((E, 4 * E), lambda i: (0, 0)),
            ],
            out_specs=[
                pl.BlockSpec((GROUP, (NT // GROUP) * E), lambda i: (0, 0)),
                pl.BlockSpec((T, N * T), lambda i: (0, 0)),
            ],
        ),
        compiler_params=pltpu.CompilerParams(
            dimension_semantics=("arbitrary",)),
    )(qkv, w_pack)

    # Free wrapper-side unpacking of the lane-dense slabs.
    out = (out_slab.reshape(GROUP, NT // GROUP, E)
           .transpose(1, 0, 2).reshape(N, T, E))
    attn_w = attnw_slab.reshape(T, N, T).transpose(1, 0, 2)
    return out, attn_w


def mha_reference(q, k, v, wq, wk, wv, wo, mask):
    """Pure-JAX reference mirroring nn.MultiheadAttention semantics."""
    n, t, e = q.shape
    qp = jnp.einsum("nte,fe->ntf", q, wq)
    kp = jnp.einsum("nte,fe->ntf", k, wk)
    vp = jnp.einsum("nte,fe->ntf", v, wv)

    def split(x):
        return x.reshape(n, t, HEADS, HEAD_DIM).transpose(0, 2, 1, 3)  # [N,H,T,Dh]

    qh, kh, vh = split(qp), split(kp), split(vp)
    s = jnp.einsum("nhqd,nhkd->nhqk", qh, kh) / math.sqrt(HEAD_DIM) + mask
    p = jax.nn.softmax(s, axis=-1)
    ctx = jnp.einsum("nhqk,nhkd->nhqd", p, vh)
    ctx = ctx.transpose(0, 2, 1, 3).reshape(n, t, e)
    out = jnp.einsum("nte,fe->ntf", ctx, wo)
    return out, p.mean(axis=1)


if __name__ == "__main__":
    key = jax.random.PRNGKey(0)
    kq, kk, kv, kwq, kwk, kwv, kwo = jax.random.split(key, 7)

    q = jax.random.normal(kq, (N, T, E), jnp.float32)
    k = jax.random.normal(kk, (N, T, E), jnp.float32)
    v = jax.random.normal(kv, (N, T, E), jnp.float32)

    # deterministic parameter init (xavier-ish scale); PyTorch shapes:
    # in_proj_weight [3E, E] split into Wq/Wk/Wv, out_proj.weight [E, E]
    scale_w = 1.0 / math.sqrt(E)
    wq = jax.random.uniform(kwq, (E, E), jnp.float32, -scale_w, scale_w)
    wk = jax.random.uniform(kwk, (E, E), jnp.float32, -scale_w, scale_w)
    wv = jax.random.uniform(kwv, (E, E), jnp.float32, -scale_w, scale_w)
    wo = jax.random.uniform(kwo, (E, E), jnp.float32, -scale_w, scale_w)

    out, attn_w = mha_pallas(q, k, v, wq, wk, wv, wo)
    jax.block_until_ready((out, attn_w))

    # reference uses the module's additive -inf causal mask
    row = jnp.arange(T)[:, None]
    col = jnp.arange(T)[None, :]
    mask = jnp.where(col <= row, 0.0, -jnp.inf).astype(jnp.float32)

    ref_out, ref_w = mha_reference(q, k, v, wq, wk, wv, wo, mask)
    assert jnp.allclose(out, ref_out, atol=1e-4, rtol=1e-4)
    assert jnp.allclose(attn_w, ref_w, atol=2e-5, rtol=1e-4)

    print("KERNEL_OK")
</pallas_src>

<mosaic_0001>
module attributes {stable_mosaic.version = 11 : i64} {
  func.func @_mha_kernel(%arg0: i32, %arg1: memref<3x16x32xf32, #tpu.memory_space<vmem>>, %arg2: memref<32x128xf32, #tpu.memory_space<vmem>>, %arg3: memref<4x128xf32, #tpu.memory_space<vmem>>, %arg4: memref<8x16xf32, #tpu.memory_space<vmem>>) attributes {dimension_semantics = [#tpu.dimension_semantics<arbitrary>], iteration_bounds = array<i64: 1>, scalar_prefetch = 0 : i64, scratch_operands = 0 : i64, tpu.core_type = #tpu.core_type<tc>, window_params = [{pipeline_mode = #tpu.pipeline_mode<synchronous>, transform_indices = @transform_0, window_bounds = array<i64: 3, 16, 32>}, {pipeline_mode = #tpu.pipeline_mode<synchronous>, transform_indices = @transform_1, window_bounds = array<i64: 32, 128>}, {pipeline_mode = #tpu.pipeline_mode<synchronous>, transform_indices = @transform_2, window_bounds = array<i64: 4, 128>}, {pipeline_mode = #tpu.pipeline_mode<synchronous>, transform_indices = @transform_3, window_bounds = array<i64: 8, 16>}]} {
    %c0 = arith.constant 0 : index
    %c0_0 = arith.constant 0 : index
    %c0_1 = arith.constant 0 : index
    %0 = vector.load %arg1[%c0, %c0_0, %c0_1] : memref<3x16x32xf32, #tpu.memory_space<vmem>>, vector<1x16x32xf32>
    %1 = vector.shape_cast %0 : vector<1x16x32xf32> to vector<16x32xf32>
    %c1 = arith.constant 1 : index
    %c0_2 = arith.constant 0 : index
    %c0_3 = arith.constant 0 : index
    %2 = vector.load %arg1[%c1, %c0_2, %c0_3] : memref<3x16x32xf32, #tpu.memory_space<vmem>>, vector<1x16x32xf32>
    %3 = vector.shape_cast %2 : vector<1x16x32xf32> to vector<16x32xf32>
    %c2 = arith.constant 2 : index
    %c0_4 = arith.constant 0 : index
    %c0_5 = arith.constant 0 : index
    %4 = vector.load %arg1[%c2, %c0_4, %c0_5] : memref<3x16x32xf32, #tpu.memory_space<vmem>>, vector<1x16x32xf32>
    %5 = vector.shape_cast %4 : vector<1x16x32xf32> to vector<16x32xf32>
    %c0_6 = arith.constant 0 : index
    %c0_7 = arith.constant 0 : index
    %6 = vector.load %arg2[%c0_6, %c0_7] : memref<32x128xf32, #tpu.memory_space<vmem>>, vector<32x32xf32>
    %c0_8 = arith.constant 0 : index
    %c32 = arith.constant 32 : index
    %7 = vector.load %arg2[%c0_8, %c32] : memref<32x128xf32, #tpu.memory_space<vmem>>, vector<32x32xf32>
    %c0_9 = arith.constant 0 : index
    %c64 = arith.constant 64 : index
    %8 = vector.load %arg2[%c0_9, %c64] : memref<32x128xf32, #tpu.memory_space<vmem>>, vector<32x32xf32>
    %c0_10 = arith.constant 0 : index
    %c96 = arith.constant 96 : index
    %9 = vector.load %arg2[%c0_10, %c96] : memref<32x128xf32, #tpu.memory_space<vmem>>, vector<32x32xf32>
    %cst = arith.constant dense<0.000000e+00> : vector<16x32xf32>
    %10 = tpu.matmul %1, %6, %cst {dimension_numbers = #tpu.dot_dimension_numbers<[1], [0], [0], [1], [0, 0, 1, 1], [], []>} : vector<16x32xf32>, vector<32x32xf32>, vector<16x32xf32> -> vector<16x32xf32>
    %cst_11 = arith.constant dense<0.000000e+00> : vector<16x32xf32>
    %11 = tpu.matmul %3, %7, %cst_11 {dimension_numbers = #tpu.dot_dimension_numbers<[1], [0], [0], [1], [0, 0, 1, 1], [], []>} : vector<16x32xf32>, vector<32x32xf32>, vector<16x32xf32> -> vector<16x32xf32>
    %cst_12 = arith.constant dense<0.000000e+00> : vector<16x32xf32>
    %12 = tpu.matmul %5, %8, %cst_12 {dimension_numbers = #tpu.dot_dimension_numbers<[1], [0], [0], [1], [0, 0, 1, 1], [], []>} : vector<16x32xf32>, vector<32x32xf32>, vector<16x32xf32> -> vector<16x32xf32>
    %13 = tpu.iota {dimensions = array<i32: 0>} : vector<16x16xi32>
    %14 = tpu.iota {dimensions = array<i32: 1>} : vector<16x16xi32>
    %c3_i32 = arith.constant 3 : i32
    %15 = vector.broadcast %c3_i32 : i32 to vector<16x16xi32>
    %16 = arith.shrsi %13, %15 : vector<16x16xi32>
    %c3_i32_13 = arith.constant 3 : i32
    %17 = vector.broadcast %c3_i32_13 : i32 to vector<16x16xi32>
    %18 = arith.shrsi %14, %17 : vector<16x16xi32>
    %19 = arith.cmpi eq, %16, %18 : vector<16x16xi32>
    %20 = arith.cmpi sle, %14, %13 : vector<16x16xi32>
    %21 = arith.andi %19, %20 : vector<16x16xi1>
    %cst_14 = arith.constant 0.000000e+00 : f32
    %22 = vector.broadcast %cst_14 : f32 to vector<16x32xf32>
    %cst_15 = arith.constant 0.000000e+00 : f32
    %23 = vector.broadcast %cst_15 : f32 to vector<16x16xf32>
    %24 = vector.extract_strided_slice %10 {offsets = [0, 0], sizes = [16, 8], strides = [1, 1]} : vector<16x32xf32> to vector<16x8xf32>
    %25 = vector.extract_strided_slice %11 {offsets = [0, 0], sizes = [16, 8], strides = [1, 1]} : vector<16x32xf32> to vector<16x8xf32>
    %26 = vector.extract_strided_slice %12 {offsets = [0, 0], sizes = [16, 8], strides = [1, 1]} : vector<16x32xf32> to vector<16x8xf32>
    %cst_16 = arith.constant dense<0.000000e+00> : vector<16x16xf32>
    %27 = tpu.matmul %24, %25, %cst_16 {dimension_numbers = #tpu.dot_dimension_numbers<[1], [1], [0], [0], [0, 0, 1, 0], [], []>} : vector<16x8xf32>, vector<16x8xf32>, vector<16x16xf32> -> vector<16x16xf32>
    %cst_17 = arith.constant -1.000000e+30 : f32
    %28 = vector.broadcast %cst_17 : f32 to vector<16x16xf32>
    %29 = arith.select %21, %27, %28 : vector<16x16xi1>, vector<16x16xf32>
    %cst_18 = arith.constant dense<0xFF800000> : vector<16xf32>
    %30 = vector.multi_reduction <maximumf>, %29, %cst_18 [1] : vector<16x16xf32> to vector<16xf32>
    %31 = vector.shape_cast %30 : vector<16xf32> to vector<16x1xf32>
    %32 = vector.broadcast %31 : vector<16x1xf32> to vector<16x16xf32>
    %33 = arith.subf %29, %32 : vector<16x16xf32>
    %34 = math.exp %33 : vector<16x16xf32>
    %cst_19 = arith.constant dense<0.000000e+00> : vector<16xf32>
    %35 = vector.multi_reduction <add>, %34, %cst_19 [1] : vector<16x16xf32> to vector<16xf32>
    %36 = vector.shape_cast %35 : vector<16xf32> to vector<16x1xf32>
    %37 = tpu.reciprocal %36 : vector<16x1xf32> -> vector<16x1xf32>
    %38 = vector.broadcast %37 : vector<16x1xf32> to vector<16x16xf32>
    %39 = arith.mulf %34, %38 : vector<16x16xf32>
    %40 = arith.addf %23, %39 : vector<16x16xf32>
    %cst_20 = arith.constant dense<0.000000e+00> : vector<16x8xf32>
    %41 = tpu.matmul %39, %26, %cst_20 {dimension_numbers = #tpu.dot_dimension_numbers<[1], [0], [0], [1], [0, 0, 1, 1], [], []>} : vector<16x16xf32>, vector<16x8xf32>, vector<16x8xf32> -> vector<16x8xf32>
    %42 = vector.extract_strided_slice %9 {offsets = [0, 0], sizes = [8, 32], strides = [1, 1]} : vector<32x32xf32> to vector<8x32xf32>
    %cst_21 = arith.constant dense<0.000000e+00> : vector<16x32xf32>
    %43 = tpu.matmul %41, %42, %cst_21 {dimension_numbers = #tpu.dot_dimension_numbers<[1], [0], [0], [1], [0, 0, 1, 1], [], []>} : vector<16x8xf32>, vector<8x32xf32>, vector<16x32xf32> -> vector<16x32xf32>
    %44 = arith.addf %22, %43 : vector<16x32xf32>
    %45 = vector.extract_strided_slice %10 {offsets = [0, 8], sizes = [16, 8], strides = [1, 1]} : vector<16x32xf32> to vector<16x8xf32>
    %46 = vector.extract_strided_slice %11 {offsets = [0, 8], sizes = [16, 8], strides = [1, 1]} : vector<16x32xf32> to vector<16x8xf32>
    %47 = vector.extract_strided_slice %12 {offsets = [0, 8], sizes = [16, 8], strides = [1, 1]} : vector<16x32xf32> to vector<16x8xf32>
    %cst_22 = arith.constant dense<0.000000e+00> : vector<16x16xf32>
    %48 = tpu.matmul %45, %46, %cst_22 {dimension_numbers = #tpu.dot_dimension_numbers<[1], [1], [0], [0], [0, 0, 1, 0], [], []>} : vector<16x8xf32>, vector<16x8xf32>, vector<16x16xf32> -> vector<16x16xf32>
    %cst_23 = arith.constant -1.000000e+30 : f32
    %49 = vector.broadcast %cst_23 : f32 to vector<16x16xf32>
    %50 = arith.select %21, %48, %49 : vector<16x16xi1>, vector<16x16xf32>
    %cst_24 = arith.constant dense<0xFF800000> : vector<16xf32>
    %51 = vector.multi_reduction <maximumf>, %50, %cst_24 [1] : vector<16x16xf32> to vector<16xf32>
    %52 = vector.shape_cast %51 : vector<16xf32> to vector<16x1xf32>
    %53 = vector.broadcast %52 : vector<16x1xf32> to vector<16x16xf32>
    %54 = arith.subf %50, %53 : vector<16x16xf32>
    %55 = math.exp %54 : vector<16x16xf32>
    %cst_25 = arith.constant dense<0.000000e+00> : vector<16xf32>
    %56 = vector.multi_reduction <add>, %55, %cst_25 [1] : vector<16x16xf32> to vector<16xf32>
    %57 = vector.shape_cast %56 : vector<16xf32> to vector<16x1xf32>
    %58 = tpu.reciprocal %57 : vector<16x1xf32> -> vector<16x1xf32>
    %59 = vector.broadcast %58 : vector<16x1xf32> to vector<16x16xf32>
    %60 = arith.mulf %55, %59 : vector<16x16xf32>
    %61 = arith.addf %40, %60 : vector<16x16xf32>
    %cst_26 = arith.constant dense<0.000000e+00> : vector<16x8xf32>
    %62 = tpu.matmul %60, %47, %cst_26 {dimension_numbers = #tpu.dot_dimension_numbers<[1], [0], [0], [1], [0, 0, 1, 1], [], []>} : vector<16x16xf32>, vector<16x8xf32>, vector<16x8xf32> -> vector<16x8xf32>
    %63 = vector.extract_strided_slice %9 {offsets = [8, 0], sizes = [8, 32], strides = [1, 1]} : vector<32x32xf32> to vector<8x32xf32>
    %cst_27 = arith.constant dense<0.000000e+00> : vector<16x32xf32>
    %64 = tpu.matmul %62, %63, %cst_27 {dimension_numbers = #tpu.dot_dimension_numbers<[1], [0], [0], [1], [0, 0, 1, 1], [], []>} : vector<16x8xf32>, vector<8x32xf32>, vector<16x32xf32> -> vector<16x32xf32>
    %65 = arith.addf %44, %64 : vector<16x32xf32>
    %66 = vector.extract_strided_slice %10 {offsets = [0, 16], sizes = [16, 8], strides = [1, 1]} : vector<16x32xf32> to vector<16x8xf32>
    %67 = vector.extract_strided_slice %11 {offsets = [0, 16], sizes = [16, 8], strides = [1, 1]} : vector<16x32xf32> to vector<16x8xf32>
    %68 = vector.extract_strided_slice %12 {offsets = [0, 16], sizes = [16, 8], strides = [1, 1]} : vector<16x32xf32> to vector<16x8xf32>
    %cst_28 = arith.constant dense<0.000000e+00> : vector<16x16xf32>
    %69 = tpu.matmul %66, %67, %cst_28 {dimension_numbers = #tpu.dot_dimension_numbers<[1], [1], [0], [0], [0, 0, 1, 0], [], []>} : vector<16x8xf32>, vector<16x8xf32>, vector<16x16xf32> -> vector<16x16xf32>
    %cst_29 = arith.constant -1.000000e+30 : f32
    %70 = vector.broadcast %cst_29 : f32 to vector<16x16xf32>
    %71 = arith.select %21, %69, %70 : vector<16x16xi1>, vector<16x16xf32>
    %cst_30 = arith.constant dense<0xFF800000> : vector<16xf32>
    %72 = vector.multi_reduction <maximumf>, %71, %cst_30 [1] : vector<16x16xf32> to vector<16xf32>
    %73 = vector.shape_cast %72 : vector<16xf32> to vector<16x1xf32>
    %74 = vector.broadcast %73 : vector<16x1xf32> to vector<16x16xf32>
    %75 = arith.subf %71, %74 : vector<16x16xf32>
    %76 = math.exp %75 : vector<16x16xf32>
    %cst_31 = arith.constant dense<0.000000e+00> : vector<16xf32>
    %77 = vector.multi_reduction <add>, %76, %cst_31 [1] : vector<16x16xf32> to vector<16xf32>
    %78 = vector.shape_cast %77 : vector<16xf32> to vector<16x1xf32>
    %79 = tpu.reciprocal %78 : vector<16x1xf32> -> vector<16x1xf32>
    %80 = vector.broadcast %79 : vector<16x1xf32> to vector<16x16xf32>
    %81 = arith.mulf %76, %80 : vector<16x16xf32>
    %82 = arith.addf %61, %81 : vector<16x16xf32>
    %cst_32 = arith.constant dense<0.000000e+00> : vector<16x8xf32>
    %83 = tpu.matmul %81, %68, %cst_32 {dimension_numbers = #tpu.dot_dimension_numbers<[1], [0], [0], [1], [0, 0, 1, 1], [], []>} : vector<16x16xf32>, vector<16x8xf32>, vector<16x8xf32> -> vector<16x8xf32>
    %84 = vector.extract_strided_slice %9 {offsets = [16, 0], sizes = [8, 32], strides = [1, 1]} : vector<32x32xf32> to vector<8x32xf32>
    %cst_33 = arith.constant dense<0.000000e+00> : vector<16x32xf32>
    %85 = tpu.matmul %83, %84, %cst_33 {dimension_numbers = #tpu.dot_dimension_numbers<[1], [0], [0], [1], [0, 0, 1, 1], [], []>} : vector<16x8xf32>, vector<8x32xf32>, vector<16x32xf32> -> vector<16x32xf32>
    %86 = arith.addf %65, %85 : vector<16x32xf32>
    %87 = vector.extract_strided_slice %10 {offsets = [0, 24], sizes = [16, 8], strides = [1, 1]} : vector<16x32xf32> to vector<16x8xf32>
    %88 = vector.extract_strided_slice %11 {offsets = [0, 24], sizes = [16, 8], strides = [1, 1]} : vector<16x32xf32> to vector<16x8xf32>
    %89 = vector.extract_strided_slice %12 {offsets = [0, 24], sizes = [16, 8], strides = [1, 1]} : vector<16x32xf32> to vector<16x8xf32>
    %cst_34 = arith.constant dense<0.000000e+00> : vector<16x16xf32>
    %90 = tpu.matmul %87, %88, %cst_34 {dimension_numbers = #tpu.dot_dimension_numbers<[1], [1], [0], [0], [0, 0, 1, 0], [], []>} : vector<16x8xf32>, vector<16x8xf32>, vector<16x16xf32> -> vector<16x16xf32>
    %cst_35 = arith.constant -1.000000e+30 : f32
    %91 = vector.broadcast %cst_35 : f32 to vector<16x16xf32>
    %92 = arith.select %21, %90, %91 : vector<16x16xi1>, vector<16x16xf32>
    %cst_36 = arith.constant dense<0xFF800000> : vector<16xf32>
    %93 = vector.multi_reduction <maximumf>, %92, %cst_36 [1] : vector<16x16xf32> to vector<16xf32>
    %94 = vector.shape_cast %93 : vector<16xf32> to vector<16x1xf32>
    %95 = vector.broadcast %94 : vector<16x1xf32> to vector<16x16xf32>
    %96 = arith.subf %92, %95 : vector<16x16xf32>
    %97 = math.exp %96 : vector<16x16xf32>
    %cst_37 = arith.constant dense<0.000000e+00> : vector<16xf32>
    %98 = vector.multi_reduction <add>, %97, %cst_37 [1] : vector<16x16xf32> to vector<16xf32>
    %99 = vector.shape_cast %98 : vector<16xf32> to vector<16x1xf32>
    %100 = tpu.reciprocal %99 : vector<16x1xf32> -> vector<16x1xf32>
    %101 = vector.broadcast %100 : vector<16x1xf32> to vector<16x16xf32>
    %102 = arith.mulf %97, %101 : vector<16x16xf32>
    %103 = arith.addf %82, %102 : vector<16x16xf32>
    %cst_38 = arith.constant dense<0.000000e+00> : vector<16x8xf32>
    %104 = tpu.matmul %102, %89, %cst_38 {dimension_numbers = #tpu.dot_dimension_numbers<[1], [0], [0], [1], [0, 0, 1, 1], [], []>} : vector<16x16xf32>, vector<16x8xf32>, vector<16x8xf32> -> vector<16x8xf32>
    %105 = vector.extract_strided_slice %9 {offsets = [24, 0], sizes = [8, 32], strides = [1, 1]} : vector<32x32xf32> to vector<8x32xf32>
    %cst_39 = arith.constant dense<0.000000e+00> : vector<16x32xf32>
    %106 = tpu.matmul %104, %105, %cst_39 {dimension_numbers = #tpu.dot_dimension_numbers<[1], [0], [0], [1], [0, 0, 1, 1], [], []>} : vector<16x8xf32>, vector<8x32xf32>, vector<16x32xf32> -> vector<16x32xf32>
    %107 = arith.addf %86, %106 : vector<16x32xf32>
    %108 = vector.extract_strided_slice %107 {offsets = [0, 0], sizes = [4, 32], strides = [1, 1]} : vector<16x32xf32> to vector<4x32xf32>
    %109 = vector.extract_strided_slice %107 {offsets = [4, 0], sizes = [4, 32], strides = [1, 1]} : vector<16x32xf32> to vector<4x32xf32>
    %110 = vector.extract_strided_slice %107 {offsets = [8, 0], sizes = [4, 32], strides = [1, 1]} : vector<16x32xf32> to vector<4x32xf32>
    %111 = vector.extract_strided_slice %107 {offsets = [12, 0], sizes = [4, 32], strides = [1, 1]} : vector<16x32xf32> to vector<4x32xf32>
    %112 = tpu.concatenate %108, %109, %110, %111 in 1 : vector<4x32xf32>, vector<4x32xf32>, vector<4x32xf32>, vector<4x32xf32> -> vector<4x128xf32>
    %c0_40 = arith.constant 0 : index
    %c0_41 = arith.constant 0 : index
    %113 = vector.load %arg3[%c0_40, %c0_41] : memref<4x128xf32, #tpu.memory_space<vmem>>, vector<4x128xf32>
    tpu.vector_store %arg3[%c0_40, %c0_41], %112 {strides = array<i32>} : memref<4x128xf32, #tpu.memory_space<vmem>>, vector<4x128xf32>,
    %114 = vector.extract_strided_slice %103 {offsets = [0, 0], sizes = [8, 8], strides = [1, 1]} : vector<16x16xf32> to vector<8x8xf32>
    %115 = vector.extract_strided_slice %103 {offsets = [8, 8], sizes = [8, 8], strides = [1, 1]} : vector<16x16xf32> to vector<8x8xf32>
    %116 = tpu.concatenate %114, %115 in 1 : vector<8x8xf32>, vector<8x8xf32> -> vector<8x16xf32>
    %cst_42 = arith.constant 2.500000e-01 : f32
    %117 = vector.broadcast %cst_42 : f32 to vector<8x16xf32>
    %118 = arith.mulf %116, %117 : vector<8x16xf32>
    %c0_43 = arith.constant 0 : index
    %c0_44 = arith.constant 0 : index
    %119 = vector.load %arg4[%c0_43, %c0_44] : memref<8x16xf32, #tpu.memory_space<vmem>>, vector<8x16xf32>
    tpu.vector_store %arg4[%c0_43, %c0_44], %118 {strides = array<i32>} : memref<8x16xf32, #tpu.memory_space<vmem>>, vector<8x16xf32>,
    return
  }
  func.func @transform_0(%arg0: i32) -> (i32, i32, i32) {
    %c0_i32 = arith.constant 0 : i32
    %c0_i32_0 = arith.constant 0 : i32
    %c0_i32_1 = arith.constant 0 : i32
    %c0_i32_2 = arith.constant 0 : i32
    return %c0_i32, %c0_i32_0, %c0_i32_1 : i32, i32, i32
  }
  func.func @transform_1(%arg0: i32) -> (i32, i32) {
    %c0_i32 = arith.constant 0 : i32
    %c0_i32_0 = arith.constant 0 : i32
    %c0_i32_1 = arith.constant 0 : i32
    return %c0_i32, %c0_i32_0 : i32, i32
  }
  func.func @transform_2(%arg0: i32) -> (i32, i32) {
    %c0_i32 = arith.constant 0 : i32
    %c0_i32_0 = arith.constant 0 : i32
    %c0_i32_1 = arith.constant 0 : i32
    return %c0_i32, %c0_i32_0 : i32, i32
  }
  func.func @transform_3(%arg0: i32) -> (i32, i32) {
    %c0_i32 = arith.constant 0 : i32
    %c0_i32_0 = arith.constant 0 : i32
    %c0_i32_1 = arith.constant 0 : i32
    return %c0_i32, %c0_i32_0 : i32, i32
  }
}

</mosaic_0001>

<bundles_post_ra>
// kernel: tpu_custom_call.1
= control target key start
LH: loop header
LB: loop body
LE: loop exit
PB: predicated region body
PF: predicated region fallthrough
CT: control target
= control target key end

     0   :  { %9 = vsyncpa [#allocation3], 0  ;;  %s2273_s0 = inlined_call_operand.hbm [shape: f32[3,16,32], index: 0, kind: input, shape index: {}]   ;;  %s2274_s1 = inlined_call_operand.hbm [shape: f32[32,128], index: 1, kind: input, shape index: {}]   ;;  %s2275_s2 = inlined_call_operand.hbm [shape: f32[4,128], index: 2, kind: output, shape index: {0}]   ;;  %s2276_s3 = inlined_call_operand.hbm [shape: f32[8,16], index: 3, kind: output, shape index: {1}]  }
   0x1   :  { %10 = vsyncpa [#allocation6], 0 }
   0x2   :  { %11 = vsyncpa [#allocation4], 0 }
   0x3   :  { %12 = vsyncpa [#allocation9], 0  ;;  %s2012_s12 = smov [#allocation2]   ;;  %s1916_s16 = scalar_lea.hbm %s2273_s0, 768 }
   0x4   :  { %s18_s13 = sshll.u32 %s2012_s12, 4  ;;  %p1917_p0 = scmp.ne.s32.totalorder %s2273_s0, %s1916_s16  ;;  %s19_s13 = int_to_ptr.vmem [resolvable:$true] %s18_s13 }
   0x5   :  { %p1920_p1 = scmp.lt.u32.totalorder %s1916_s16, %s2273_s0 }
   0x7   :  { %p1922_p2 = pnand %p1920_p1, %p1917_p0 }
   0x9   :  { %1925 = shalt.err (!%p1922_p2)
}
   0xa   :  { %s1926_s21 = scalar_lea.vmem %s19_s13, 768  ;;  %p1931_p4 = scmp.lt.s32.totalorder %s19_s13, %s19_s13 }
   0xb   :  { %p1927_p3 = scmp.ne.s32.totalorder %s19_s13, %s1926_s21  ;;  %p1932_p5 = scmp.lt.s32.totalorder %s1926_s21, %s1926_s21 }
   0xd   :  { %p1933_p6 = por %p1932_p5, %p1931_p4 }
   0xf   :  { %p1934_p7 = pnand %p1933_p6, %p1927_p3 }
  0x11   :  { %1937 = shalt.err (!%p1934_p7)
}
  0x12   :  { %s2013_s22 = smov 128   ;;  %s2014_s23 = smov 8  }
  0x13   :  { %24 = dma.hbm_to_vmem [thread:$0]  %s2273_s0, 768, %s19_s13, [#allocation3], %s2013_s22, %s2013_s22, %s2014_s23  }
  0x14   :  { %s2015_s26 = smov [#allocation5]   ;;  %s1938_s30 = scalar_lea.hbm %s2274_s1, 512 }
  0x15   :  { %s30_s27 = sshll.u32 %s2015_s26, 4  ;;  %p1939_p8 = scmp.ne.s32.totalorder %s2274_s1, %s1938_s30  ;;  %s31_s27 = int_to_ptr.vmem [resolvable:$true] %s30_s27 }
  0x16   :  { %p1942_p9 = scmp.lt.u32.totalorder %s1938_s30, %s2274_s1 }
  0x18   :  { %p1944_p10 = pnand %p1942_p9, %p1939_p8 }
  0x1a   :  { %1947 = shalt.err (!%p1944_p10)
}
  0x1b   :  { %s1948_s8 = scalar_lea.vmem %s31_s27, 512  ;;  %p1953_p12 = scmp.lt.s32.totalorder %s31_s27, %s31_s27 }
  0x1c   :  { %p1949_p11 = scmp.ne.s32.totalorder %s31_s27, %s1948_s8  ;;  %p1954_p13 = scmp.lt.s32.totalorder %s1948_s8, %s1948_s8 }
  0x1e   :  { %p1955_p0 = por %p1954_p13, %p1953_p12 }
  0x20   :  { %p1956_p1 = pnand %p1955_p0, %p1949_p11 }
  0x22   :  { %1959 = shalt.err (!%p1956_p1)
}
  0x23   :  { %36 = dma.hbm_to_vmem [thread:$0]  %s2274_s1, 512, %s31_s27, [#allocation6], %s2013_s22, %s2013_s22, %s2014_s23  }
  0x24   :  { %2004 = dma.done.wait [#allocation3], 768  }
  0x25   :  { %2005 = vsyncadd [#allocation3], 4294966528 }
  0x26   :  { %2006 = dma.done.wait [#allocation6], 512  }
  0x27   :  { %2007 = vsyncadd [#allocation6], 4294966784  ;;  %vm55_vm0 = vcmask 261120   ;;  %v2068_v0 = vld [vmem:[#allocation5] sm:$0xff]  ;;  %v2070_v1 = vld [vmem:[#allocation5 + $0x8] sm:$0xff]  ;;  %s2016_s1 = smov 96   ;;  %v327_v37 = vlaneseq }
  0x28   :  { %v2072_v2 = vld [vmem:[#allocation5 + $0x10] sm:$0xff]  ;;  %v1834_v3 = vpack.i.bf16 %v2070_v1, %v2068_v0  ;;  %v2076_v4 = vld [vmem:[#allocation5 + $0x18] sm:$0xff]  ;;  %v46_v5 = vld [vmem:[#allocation2 + $0x10] sm:$0xff]  ;;  %v1752_v6 = vpack.c.bf16 %v2070_v1, %v2068_v0  ;;  %vm341_vm1 = vcmask 64512   ;;  %s2017_s10 = smov 64   ;;  %vm431_vm9 = vcmask 130048  }
  0x29   :  { %1662 = vmatprep.mubr.msk.f32.mxu1 %vm55_vm0, %v46_v5  ;;  %v1756_v7 = vpack.c.bf16 %v2076_v4, %v2072_v2  ;;  %v43_v8 = vld [vmem:[#allocation2] sm:$0xff]  ;;  %v1839_v9 = vpack.i.bf16 %v2076_v4, %v2072_v2  ;;  %v44_v10 = vld [vmem:[#allocation2 + $0x8] sm:$0xff]  ;;  %v47_v19 = vld [vmem:[#allocation2 + $0x18] sm:$0xff]  ;;  %v328_v38 = vshrl.u32 %v327_v37, 7  ;;  %v331_v40 = vand.u32 127, %v327_v37  ;;  %s2018_s11 = smov 120  }
  0x2a   :  { %1835 = vrot.lane.b32.xlu0 %v1834_v3, %s2016_s1  ;;  %1753 = vmatprep.subr.bf16.mxu0 %v1752_v6  ;;  %v49_v22 = vld [vmem:[#allocation2 + $0x20] sm:$0xff]  ;;  %vm2101_vm2 = vmpackc.low %vm341_vm1, %vm341_vm1  ;;  %v50_v36 = vld [vmem:[#allocation2 + $0x28] sm:$0xff]  ;;  %s2019_s12 = smov 112   ;;  %s2020_s13 = smov 104  }
  0x2b   :  { %1755 = vmatpush3.bf16.msra.mxu0 %v1752_v6  ;;  %1651 = vmatprep.mubr.msk.f32.mxu0 %vm55_vm0, %v43_v8  ;;  %v329_v39 = vadd.s32 8, %v328_v38  ;;  %v334_v42 = vshra.s32 %v331_v40, 3  ;;  %v332_v43 = vshra.s32 %v328_v38, 3  ;;  %vm337_vm6 = vcmp.le.s32.totalorder %v331_v40, %v328_v38  ;;  %s2021_s14 = smov 32   ;;  %s2022_s15 = smov [#allocation8]  }
  0x2c   :  { %1757 = vmatprep.subr.bf16.mxu0 %v1756_v7  ;;  %1845 = vrot.lane.b32.xlu1 %v1834_v3, %s2017_s10  ;;  %s1529_s16 = sshll.u32 %s2022_s15, 4  ;;  %s1530_s16 = int_to_ptr.vmem [resolvable:$true] %s1529_s16 }
  0x2d   :  { %v333_v41 = vshra.s32 %v329_v39, 3  ;;  %vm338_vm4 = vcmp.le.s32.totalorder %v331_v40, %v329_v39  ;;  %vm335_vm5 = vcmp.eq.s32.totalorder %v332_v43, %v334_v42  ;;  %s1960_s17 = scalar_lea.vmem %s1530_s16, 128  ;;  %p1965_p3 = scmp.lt.s32.totalorder %s1530_s16, %s1530_s16 }
  0x2e   :  { %1840 = vrot.lane.b32.xlu0 %v1839_v9, %s2016_s1  ;;  %vm2118_vm8 = vmand %vm335_vm5, %vm337_vm6  ;;  %p1961_p2 = scmp.ne.s32.totalorder %s1530_s16, %s1960_s17  ;;  %p1966_p4 = scmp.lt.s32.totalorder %s1960_s17, %s1960_s17 }
  0x2f   :  { %1759 = vmatpush3.bf16.msra.mxu0 %v1756_v7  ;;  %vm336_vm3 = vcmp.eq.s32.totalorder %v333_v41, %v334_v42 }
  0x30   :  { %1850 = vrot.lane.b32.xlu1 %v1839_v9, %s2017_s10  ;;  %vm2114_vm7 = vmand %vm336_vm3, %vm338_vm4  ;;  %p1967_p5 = por %p1966_p4, %p1965_p3 }
  0x32   :  { %1652 = vmatmul.mubr.msk.f32.vlgmr.msra.gmra.mrb[0].mxu0 %vm55_vm0, %v44_v10  ;;  %p1968_p6 = pnand %p1967_p5, %p1961_p2 }
  0x33   :  { %1673 = vmatprep.mubr.msk.f32.mxu0 %vm55_vm0, %v49_v22 }
  0x9c   :  { %v1836_v11 = vpop.permute.xlu0 %1835 }
  0x9d   :  { %v1838_v12 = vunpack.i.h.bf16 %v1836_v11  ;;  %v1837_v13 = vunpack.i.l.bf16 %v1836_v11 }
  0x9e   :  { %v1846_v24 = vpop.permute.xlu1 %1845 }
  0x9f   :  { %v1760_v14 = vpack.c.bf16 %v1838_v12, %v1837_v13  ;;  %v1848_v27 = vunpack.i.h.bf16 %v1846_v24  ;;  %v1847_v28 = vunpack.i.l.bf16 %v1846_v24 }
  0xa0   :  { %v1841_v15 = vpop.permute.xlu0 %1840 }
  0xa1   :  { %v1843_v16 = vunpack.i.h.bf16 %v1841_v15  ;;  %v1842_v17 = vunpack.i.l.bf16 %v1841_v15  ;;  %1761 = vmatprep.subr.bf16.mxu1 %v1760_v14  ;;  %v1768_v31 = vpack.c.bf16 %v1848_v27, %v1847_v28 }
  0xa2   :  { %1763 = vmatpush3.bf16.msra.mxu1 %v1760_v14  ;;  %v1851_v32 = vpop.permute.xlu1 %1850 }
  0xa3   :  { %v1764_v18 = vpack.c.bf16 %v1843_v16, %v1842_v17  ;;  %v1853_v33 = vunpack.i.h.bf16 %v1851_v32  ;;  %v1852_v34 = vunpack.i.l.bf16 %v1851_v32  ;;  %1769 = vmatprep.subr.bf16.mxu0 %v1768_v31 }
  0xa4   :  { %1771 = vmatpush3.bf16.msra.mxu0 %v1768_v31 }
  0xa5   :  { %1765 = vmatprep.subr.bf16.mxu1 %v1764_v18  ;;  %v1772_v35 = vpack.c.bf16 %v1853_v33, %v1852_v34 }
  0xa6   :  { %1767 = vmatpush3.bf16.msra.mxu1 %v1764_v18 }
  0xa7   :  { %1773 = vmatprep.subr.bf16.mxu0 %v1772_v35 }
  0xa8   :  { %1775 = vmatpush3.bf16.msra.mxu0 %v1772_v35 }
  0xa9   :  { %1663 = vmatmul.mubr.msk.f32.vlgmr.msra.gmra.mrb[0].mxu1 %vm55_vm0, %v47_v19 }
  0xab   :  { %1674 = vmatmul.mubr.msk.f32.vlgmr.msra.gmra.mrb[2].mxu0 %vm55_vm0, %v50_v36 }
 0x105   :  { %v2090_v20 = vpop.f32.mrb[0].mxu0 }
 0x106   :  { %v2092_v21 = vpop.f32.mrb[1].mxu0 }
 0x107   :  { %1680 = vmatprep.mubr.msk.f32.mxu1 %vm341_vm1, %v2092_v21 }
 0x17c   :  { %v1664_v23 = vpop.f32.mrb[0].mxu1 }
 0x17d   :  { %v225_v25 = vpop.f32.mrb[1].mxu1 }
 0x17e   :  { %v1776_v29 = vpack.c.bf16 %v1664_v23, %v225_v25  ;;  %v2105_v30 = vpack.i.bf16 %v1664_v23, %v225_v25  ;;  %v1675_v52 = vpop.f32.mrb[2].mxu0 }
 0x17f   :  { %v318_v53 = vpop.f32.mrb[3].mxu0 }
 0x180   :  { %1778 = vmatprep.subr.msk.bf16.mxu1 %vm2101_vm2, %v1776_v29  ;;  %v1782_v54 = vpack.c.bf16 %v1675_v52, %v318_v53  ;;  %v2140_v9 = vpack.i.bf16 %v1675_v52, %v318_v53 }
 0x181   :  { %1781 = vmatpush3.bf16.xpose.msk.msra.mxu1 %vm2101_vm2, %v1776_v29 }
 0x182   :  { %1783 = vmatprep.subr.bf16.mxu1 %v1782_v54 }
 0x188   :  { %1681 = vmatmul.mubr.msk.f32.vlgmr.msra.gmra.mrb[2].mxu1 %vm341_vm1, %v2090_v20 }
 0x189   :  { %1785 = vmatpush3.bf16.msra.mxu1 %v1782_v54 }
 0x25b   :  { %v1682_v46 = vpop.f32.mrb[2].mxu1 }
 0x25c   :  { %v430_v47 = vsel %vm2114_vm7, %v1682_v46, -1e+30  ;;  %v420_v48 = vpop.f32.mrb[3].mxu1 }
 0x25d   :  { %v429_v49 = vsel %vm2118_vm8, %v420_v48, -1e+30  ;;  %v435_v50 = vsel %vm431_vm9, %v430_v47, -inf }
 0x25e   :  { %436 = vmax.xlane.f32.xlu1 %v435_v50  ;;  %v432_v51 = vsel %vm431_vm9, %v429_v49, -inf }
 0x25f   :  { %433 = vmax.xlane.f32.xlu0 %v432_v51 }
 0x26f   :  { %1855 = vrot.lane.b32.xlu1 %v2105_v30, %s2018_s11 }
 0x273   :  { %539 = vrot.lane.b32.xlu1 %v2090_v20, %s2018_s11 }
 0x277   :  { %1860 = vrot.lane.b32.xlu1 %v2105_v30, %s2019_s12 }
 0x27b   :  { %913 = vrot.lane.b32.xlu1 %v2090_v20, %s2019_s12 }
 0x2eb   :  { %v437_v55 = vpop.xlane.xlu1 %436 }
 0x2ec   :  { %v439_v56 = vsub.f32 %v430_v47, %v437_v55  ;;  %v434_v57 = vpop.xlane.xlu0 %433 }
 0x2ed   :  { %v438_v58 = vsub.f32 %v429_v49, %v434_v57 }
 0x2ee   :  { %v442_v59 = vmul.f32 1.442695, %v439_v56 }
 0x2ef   :  { %v440_v60 = vmul.f32 1.442695, %v438_v58  ;;  %v1856_v61 = vpop.permute.xlu1 %1855 }
 0x2f0   :  { %v1858_v62 = vunpack.i.h.bf16 %v1856_v61  ;;  %v1857_v63 = vunpack.i.l.bf16 %v1856_v61 }
 0x2f1   :  { %1884 = vpow2.f32 %v440_v60 }
 0x2f2   :  { %v1786_v3 = vpack.c.bf16 %v1858_v62, %v1857_v63  ;;  %1886 = vpow2.f32 %v442_v59 }
 0x2f3   :  { %v540_v12 = vpop.permute.xlu1 %539 }
 0x2f4   :  { %1788 = vmatprep.subr.msk.bf16.mxu1 %vm2101_vm2, %v1786_v3 }
 0x2f7   :  { %v1861_v14 = vpop.permute.xlu1 %1860 }
 0x2f8   :  { %v1863_v16 = vunpack.i.h.bf16 %v1861_v14  ;;  %v1862_v17 = vunpack.i.l.bf16 %v1861_v14 }
 0x2fa   :  { %v1796_v22 = vpack.c.bf16 %v1863_v16, %v1862_v17 }
 0x2fb   :  { %v1885_v5 = vpop.eup %1884  ;;  %v914_v25 = vpop.permute.xlu1 %913 }
 0x2fc   :  { %v444_v6 = vsel %vm431_vm9, %v1885_v5, 0.0  ;;  %v1887_v7 = vpop.eup %1886 }
 0x2fd   :  { %445 = vadd.xlane.f32.xlu0 %v444_v6  ;;  %v447_v8 = vsel %vm431_vm9, %v1887_v7, 0.0 }
 0x301   :  { %448 = vadd.xlane.f32.xlu0 %v447_v8 }
 0x317   :  { %537 = vrot.lane.b32.xlu0 %v2092_v21, %s2018_s11 }
 0x31b   :  { %911 = vrot.lane.b32.xlu0 %v2092_v21, %s2019_s12 }
 0x38a   :  { %v446_v10 = vpop.xlane.xlu0 %445 }
 0x38b   :  { %1888 = vrcp.f32 %v446_v10 }
 0x38e   :  { %v449_v11 = vpop.xlane.xlu0 %448 }
 0x38f   :  { %1890 = vrcp.f32 %v449_v11 }
 0x392   :  { %v538_v23 = vpop.permute.xlu0 %537 }
 0x395   :  { %v1889_v13 = vpop.eup %1888 }
 0x396   :  { %v2146_v15 = vmul.f32 %v1889_v13, %v1885_v5  ;;  %v912_v24 = vpop.permute.xlu0 %911 }
 0x398   :  { %1687 = vmatprep.mubr.msk.f32.mxu1 %vm431_vm9, %v2146_v15 }
 0x399   :  { %v1891_v18 = vpop.eup %1890 }
 0x39a   :  { %v2150_v19 = vmul.f32 %v1891_v18, %v1887_v7 }
 0x39c   :  { %1688 = vmatmul.mubr.msk.f32.vlgmr.msra.gmra.mrb[4].mxu1 %vm431_vm9, %v2150_v19 }
 0x39d   :  { %1791 = vmatpush3.bf16.xpose.msk.msra.mxu1 %vm2101_vm2, %v1786_v3  ;;  %1694 = vmatprep.mubr.msk.f32.mxu1 %vm341_vm1, %v538_v23 }
 0x39e   :  { %1798 = vmatprep.subr.msk.bf16.mxu1 %vm2101_vm2, %v1796_v22 }
 0x3a4   :  { %1695 = vmatmul.mubr.msk.f32.vlgmr.msra.gmra.mrb[6].mxu1 %vm341_vm1, %v540_v12 }
 0x3a5   :  { %1801 = vmatpush3.bf16.xpose.msk.msra.mxu1 %vm2101_vm2, %v1796_v22  ;;  %1718 = vmatprep.mubr.msk.f32.mxu1 %vm341_vm1, %v912_v24 }
 0x3ac   :  { %1719 = vmatmul.mubr.msk.f32.vlgmr.msra.gmra.mrb[8].mxu1 %vm341_vm1, %v914_v25 }
 0x46f   :  { %v2164_v27 = vpop.f32.mrb[4].mxu1 }
 0x470   :  { %v2166_v28 = vpop.f32.mrb[5].mxu1 }
 0x477   :  { %v1696_v29 = vpop.f32.mrb[6].mxu1 }
 0x478   :  { %v629_v31 = vsel %vm2114_vm7, %v1696_v29, -1e+30  ;;  %v619_v32 = vpop.f32.mrb[7].mxu1 }
 0x479   :  { %v628_v33 = vsel %vm2118_vm8, %v619_v32, -1e+30  ;;  %v633_v34 = vsel %vm431_vm9, %v629_v31, -inf }
 0x47a   :  { %634 = vmax.xlane.f32.xlu1 %v633_v34  ;;  %v630_v35 = vsel %vm431_vm9, %v628_v33, -inf }
 0x47b   :  { %631 = vmax.xlane.f32.xlu0 %v630_v35 }
 0x47f   :  { %v1720_v36 = vpop.f32.mrb[8].mxu1 }
 0x480   :  { %v993_v37 = vpop.f32.mrb[9].mxu1  ;;  %v1003_v38 = vsel %vm2114_vm7, %v1720_v36, -1e+30 }
 0x481   :  { %v1007_v39 = vsel %vm431_vm9, %v1003_v38, -inf  ;;  %v1002_v59 = vsel %vm2118_vm8, %v993_v37, -1e+30 }
 0x482   :  { %v1004_v60 = vsel %vm431_vm9, %v1002_v59, -inf }
 0x48b   :  { %1865 = vrot.lane.b32.xlu1 %v2140_v9, %s2018_s11 }
 0x48f   :  { %1201 = vrot.lane.b32.xlu1 %v2092_v21, %s2020_s13 }
 0x493   :  { %1203 = vrot.lane.b32.xlu1 %v2090_v20, %s2020_s13 }
 0x4b7   :  { %1008 = vmax.xlane.f32.xlu1 %v1007_v39 }
 0x4c8   :  { %743 = vrot.lane.b32.xlu1 %v2070_v1, %s2021_s14 }
 0x4cc   :  { %1875 = vrot.lane.b32.xlu1 %v2140_v9, %s2019_s12 }
 0x507   :  { %v635_v40 = vpop.xlane.xlu1 %634 }
 0x508   :  { %v637_v41 = vsub.f32 %v629_v31, %v635_v40  ;;  %v632_v42 = vpop.xlane.xlu0 %631 }
 0x509   :  { %v636_v21 = vsub.f32 %v628_v33, %v632_v42 }
 0x50a   :  { %v640_v43 = vmul.f32 1.442695, %v637_v41 }
 0x50b   :  { %v638_v46 = vmul.f32 1.442695, %v636_v21  ;;  %v1866_v20 = vpop.permute.xlu1 %1865 }
 0x50c   :  { %v1868_v47 = vunpack.i.h.bf16 %v1866_v20  ;;  %v1867_v48 = vunpack.i.l.bf16 %v1866_v20 }
 0x50d   :  { %1892 = vpow2.f32 %v638_v46 }
 0x50e   :  { %v1792_v49 = vpack.c.bf16 %v1868_v47, %v1867_v48  ;;  %1894 = vpow2.f32 %v640_v43 }
 0x50f   :  { %v1202_v50 = vpop.permute.xlu1 %1201 }
 0x510   :  { %1793 = vmatprep.subr.bf16.mxu0 %v1792_v49  ;;  %1737 = vmatprep.mubr.msk.f32.mxu1 %vm341_vm1, %v1202_v50 }
 0x511   :  { %1795 = vmatpush3.bf16.msra.mxu0 %v1792_v49 }
 0x513   :  { %v1204_v54 = vpop.permute.xlu1 %1203 }
 0x517   :  { %v1893_v1 = vpop.eup %1892 }
 0x518   :  { %v642_v51 = vsel %vm431_vm9, %v1893_v1, 0.0  ;;  %v1895_v52 = vpop.eup %1894 }
 0x519   :  { %643 = vadd.xlane.f32.xlu0 %v642_v51  ;;  %v645_v53 = vsel %vm431_vm9, %v1895_v52, 0.0 }
 0x51d   :  { %646 = vadd.xlane.f32.xlu0 %v645_v53 }
 0x533   :  { %1870 = vrot.lane.b32.xlu0 %v2105_v30, %s2020_s13 }
 0x544   :  { %v1009_v55 = vpop.xlane.xlu1 %1008 }
 0x545   :  { %v1011_v56 = vsub.f32 %v1003_v38, %v1009_v55 }
 0x547   :  { %v1014_v57 = vmul.f32 1.442695, %v1011_v56 }
 0x548   :  { %v744_v58 = vpop.permute.xlu1 %743 }
 0x549   :  { %1896 = vpow2.f32 %v1014_v57  ;;  %1704 = vmatprep.subr.mxu0 %v744_v58 }
 0x54c   :  { %v1876_v24 = vpop.permute.xlu1 %1875 }
 0x54d   :  { %v1878_v32 = vunpack.i.h.bf16 %v1876_v24  ;;  %v1877_v33 = vunpack.i.l.bf16 %v1876_v24 }
 0x552   :  { %1005 = vmax.xlane.f32.xlu0 %v1004_v60 }
 0x553   :  { %v1897_v61 = vpop.eup %1896 }
 0x554   :  { %v1019_v62 = vsel %vm431_vm9, %v1897_v61, 0.0 }
 0x556   :  { %1020 = vadd.xlane.f32.xlu0 %v1019_v62 }
 0x5a6   :  { %v644_v63 = vpop.xlane.xlu0 %643 }
 0x5a7   :  { %1898 = vrcp.f32 %v644_v63 }
 0x5aa   :  { %v647_v30 = vpop.xlane.xlu0 %646 }
 0x5ab   :  { %1900 = vrcp.f32 %v647_v30 }
 0x5ae   :  { %v1871_v3 = vpop.permute.xlu0 %1870 }
 0x5af   :  { %v1873_v5 = vunpack.i.h.bf16 %v1871_v3  ;;  %v1872_v6 = vunpack.i.l.bf16 %v1871_v3 }
 0x5b1   :  { %v1899_v7 = vpop.eup %1898  ;;  %v1806_v8 = vpack.c.bf16 %v1873_v5, %v1872_v6 }
 0x5b2   :  { %v650_v10 = vmul.f32 %v1899_v7, %v1893_v1 }
 0x5b3   :  { %1808 = vmatprep.subr.msk.bf16.mxu1 %vm2101_vm2, %v1806_v8 }
 0x5b4   :  { %1701 = vmatprep.mubr.msk.f32.mxu0 %vm431_vm9, %v650_v10  ;;  %1811 = vmatpush3.bf16.xpose.msk.msra.mxu1 %vm2101_vm2, %v1806_v8  ;;  %v652_v29 = vadd.f32 %v650_v10, %v2146_v15 }
 0x5b5   :  { %v1901_v11 = vpop.eup %1900 }
 0x5b6   :  { %v2201_v12 = vmul.f32 %v1901_v11, %v1895_v52 }
 0x5b8   :  { %1702 = vmatmul.mubr.msk.f32.vlgmr.msra.gmra.mrb[4].mxu0 %vm431_vm9, %v2201_v12 }
 0x5b9   :  { %1705 = vmatpush3.msra.mxu0 %v744_v58 }
 0x5bb   :  { %1738 = vmatmul.mubr.msk.f32.vlgmr.msra.gmra.mrb[10].mxu1 %vm341_vm1, %v1204_v54 }
 0x5df   :  { %v1006_v13 = vpop.xlane.xlu0 %1005 }
 0x5e0   :  { %v1010_v14 = vsub.f32 %v1002_v59, %v1006_v13 }
 0x5e2   :  { %v1012_v16 = vmul.f32 1.442695, %v1010_v14 }
 0x5e3   :  { %v1021_v26 = vpop.xlane.xlu0 %1020 }
 0x5e4   :  { %1902 = vpow2.f32 %v1012_v16 }
 0x5ee   :  { %v1903_v17 = vpop.eup %1902 }
 0x5ef   :  { %v1016_v18 = vsel %vm431_vm9, %v1903_v17, 0.0 }
 0x5f0   :  { %1017 = vadd.xlane.f32.xlu0 %v1016_v18 }
 0x606   :  { %827 = vrot.lane.b32.xlu0 %v2068_v0, %s2021_s14  ;;  %v1802_v0 = vpack.c.bf16 %v1878_v32, %v1877_v33 }
 0x67d   :  { %v1018_v22 = vpop.xlane.xlu0 %1017 }
 0x67e   :  { %1904 = vrcp.f32 %v1018_v22 }
 0x67f   :  { %1906 = vrcp.f32 %v1021_v26 }
 0x681   :  { %v828_v23 = vpop.permute.xlu0 %827 }
 0x682   :  { %1709 = vmatprep.subr.mxu0 %v828_v23 }
 0x688   :  { %v1905_v25 = vpop.eup %1904 }
 0x689   :  { %v1024_v31 = vmul.f32 %v1905_v25, %v1903_v17  ;;  %v1907_v42 = vpop.eup %1906 }
 0x68a   :  { %v1025_v44 = vmul.f32 %v1907_v42, %v1897_v61 }
 0x68b   :  { %v1703_v34 = vpop.f32.mrb[4].mxu0  ;;  %v2210_v35 = vadd.f32 %v1024_v31, %v652_v29 }
 0x68c   :  { %v734_v36 = vpop.f32.mrb[5].mxu0 }
 0x68d   :  { %1706 = vmatprep.mubr.msk.f32.mxu0 %vm341_vm1, %v734_v36 }
 0x68e   :  { %1707 = vmatmul.mubr.msk.f32.vlgmr.msra.gmra.mrb[6].mxu0 %vm341_vm1, %v1703_v34  ;;  %v1739_v37 = vpop.f32.mrb[10].mxu1 }
 0x68f   :  { %1710 = vmatpush3.msra.mxu0 %v828_v23  ;;  %v1293_v38 = vsel %vm2114_vm7, %v1739_v37, -1e+30  ;;  %1711 = vmatprep.mubr.msk.f32.mxu0 %vm341_vm1, %v2166_v28  ;;  %v1283_v15 = vpop.f32.mrb[11].mxu1 }
 0x690   :  { %1803 = vmatprep.subr.bf16.mxu0 %v1802_v0  ;;  %v1292_v39 = vsel %vm2118_vm8, %v1283_v15, -1e+30  ;;  %v1297_v40 = vsel %vm431_vm9, %v1293_v38, -inf }
 0x691   :  { %1298 = vmax.xlane.f32.xlu0 %v1297_v40  ;;  %v1294_v41 = vsel %vm431_vm9, %v1292_v39, -inf }
 0x692   :  { %1295 = vmax.xlane.f32.xlu1 %v1294_v41 }
 0x696   :  { %1712 = vmatmul.mubr.msk.f32.vlgmr.msra.gmra.mrb[6].mxu0 %vm341_vm1, %v2164_v27 }
 0x697   :  { %1805 = vmatpush3.bf16.msra.mxu0 %v1802_v0  ;;  %1725 = vmatprep.mubr.msk.f32.mxu0 %vm431_vm9, %v1024_v31 }
 0x69a   :  { %1726 = vmatmul.mubr.msk.f32.vlgmr.msra.gmra.mrb[8].mxu0 %vm431_vm9, %v1025_v44 }
 0x71e   :  { %v1299_v28 = vpop.xlane.xlu0 %1298 }
 0x71f   :  { %v1301_v21 = vsub.f32 %v1293_v38, %v1299_v28  ;;  %v1296_v45 = vpop.xlane.xlu1 %1295 }
 0x720   :  { %v1300_v43 = vsub.f32 %v1292_v39, %v1296_v45 }
 0x721   :  { %v1304_v46 = vmul.f32 1.442695, %v1301_v21 }
 0x722   :  { %v1302_v20 = vmul.f32 1.442695, %v1300_v43 }
 0x723   :  { %1908 = vpow2.f32 %v1304_v46 }
 0x724   :  { %1910 = vpow2.f32 %v1302_v20 }
 0x72d   :  { %v1909_v47 = vpop.eup %1908 }
 0x72e   :  { %v1911_v48 = vpop.eup %1910  ;;  %v1309_v49 = vsel %vm431_vm9, %v1909_v47, 0.0 }
 0x72f   :  { %1310 = vadd.xlane.f32.xlu1 %v1309_v49  ;;  %v1306_v27 = vsel %vm431_vm9, %v1911_v48, 0.0 }
 0x730   :  { %1307 = vadd.xlane.f32.xlu0 %v1306_v27 }
 0x740   :  { %1880 = vrot.lane.b32.xlu1 %v2140_v9, %s2020_s13 }
 0x744   :  { %1405 = vrot.lane.b32.xlu1 %v2076_v4, %s2021_s14 }
 0x746   :  { %1115 = vrot.lane.b32.xlu0 %v2072_v2, %s2021_s14  ;;  %v653_v2 = vadd.f32 %v2201_v12, %v2150_v19 }
 0x748   :  { %v1027_v60 = vadd.f32 %v1025_v44, %v653_v2 }
 0x76d   :  { %v1727_v50 = vpop.f32.mrb[8].mxu0 }
 0x76e   :  { %v1106_v1 = vpop.f32.mrb[9].mxu0 }
 0x76f   :  { %1730 = vmatprep.mubr.msk.f32.mxu0 %vm341_vm1, %v1106_v1 }
 0x7bc   :  { %v1311_v51 = vpop.xlane.xlu1 %1310 }
 0x7bd   :  { %1912 = vrcp.f32 %v1311_v51  ;;  %v1308_v52 = vpop.xlane.xlu0 %1307 }
 0x7be   :  { %1914 = vrcp.f32 %v1308_v52 }
 0x7c0   :  { %v1881_v53 = vpop.permute.xlu1 %1880 }
 0x7c1   :  { %v1883_v54 = vunpack.i.h.bf16 %v1881_v53  ;;  %v1882_v55 = vunpack.i.l.bf16 %v1881_v53  ;;  %v1116_v56 = vpop.permute.xlu0 %1115 }
 0x7c2   :  { %1728 = vmatprep.subr.mxu0 %v1116_v56 }
 0x7c3   :  { %v1812_v9 = vpack.c.bf16 %v1883_v54, %v1882_v55  ;;  %1729 = vmatpush3.msra.mxu0 %v1116_v56 }
 0x7c4   :  { %1731 = vmatmul.mubr.msk.f32.vlgmr.msra.gmra.mrb[6].mxu0 %vm341_vm1, %v1727_v50  ;;  %v1406_v4 = vpop.permute.xlu1 %1405 }
 0x7c5   :  { %1813 = vmatprep.subr.bf16.mxu0 %v1812_v9 }
 0x7c6   :  { %1815 = vmatpush3.bf16.msra.mxu0 %v1812_v9 }
 0x7c7   :  { %v1913_v57 = vpop.eup %1912  ;;  %1747 = vmatprep.subr.mxu0 %v1406_v4 }
 0x7c8   :  { %v1915_v58 = vpop.eup %1914  ;;  %v1315_v59 = vmul.f32 %v1913_v57, %v1909_v47 }
 0x7c9   :  { %v1314_v61 = vmul.f32 %v1915_v58, %v1911_v48 }
 0x7ca   :  { %v1317_v62 = vadd.f32 %v1315_v59, %v1027_v60 }
 0x7cb   :  { %v1316_v63 = vadd.f32 %v1314_v61, %v2210_v35  ;;  %1744 = vmatprep.mubr.msk.f32.mxu0 %vm431_vm9, %v1314_v61 }
 0x7cc   :  { %1745 = vmatmul.mubr.msk.f32.vlgmr.msra.gmra.mrb[10].mxu0 %vm431_vm9, %v1315_v59 }
 0x7cd   :  { %1748 = vmatpush3.msra.mxu0 %v1406_v4  ;;  %v1510_v30 = vsel %vm341_vm1, %v1316_v63, %v1317_v62 }
 0x7ce   :  { %v1511_v3 = vmul.f32 0.25, %v1510_v30 }
 0x7d0   :  { %1512 = vst.msk [vmem:[#allocation8] sm:$0xff] %vm431_vm9, %v1511_v3 }
 0x89f   :  { %v1746_v19 = vpop.f32.mrb[10].mxu0 }
 0x8a0   :  { %v1396_v5 = vpop.f32.mrb[11].mxu0 }
 0x8a1   :  { %1749 = vmatprep.mubr.msk.f32.mxu0 %vm341_vm1, %v1396_v5 }
 0x8a2   :  { %1750 = vmatmul.mubr.msk.f32.vlgmr.msra.gmra.mrb[6].mxu0 %vm341_vm1, %v1746_v19 }
 0x8a3   :  { %1971 = shalt.err (!%p1968_p6)
}
 0x8a4   :  { %s1972_s20 = scalar_lea.hbm %s2276_s3, 128 }
 0x8a5   :  { %p1973_p7 = scmp.ne.s32.totalorder %s2276_s3, %s1972_s20  ;;  %p1976_p8 = scmp.lt.u32.totalorder %s1972_s20, %s2276_s3 }
 0x8a7   :  { %p1978_p9 = pnand %p1976_p8, %p1973_p7 }
 0x8a9   :  { %1981 = shalt.err (!%p1978_p9)
}
 0x8aa   :  { %1532 = dma.vmem_to_hbm [thread:$0]  %s1530_s16, 128, %s2276_s3, [#allocation9]   ;;  %vm1505_vm10 = vcmask 523264   ;;  %vm1507_vm11 = vcmask 785408  }
 0x8ab   :  { %s2023_s27 = smov [#allocation7]  }
 0x8ac   :  { %s1519_s28 = sshll.u32 %s2023_s27, 4  ;;  %s1520_s28 = int_to_ptr.vmem [resolvable:$true] %s1519_s28 }
 0x8ad   :  { %s1982_s3 = scalar_lea.vmem %s1520_s28, 64  ;;  %p1987_p11 = scmp.lt.s32.totalorder %s1520_s28, %s1520_s28 }
 0x8ae   :  { %p1983_p10 = scmp.ne.s32.totalorder %s1520_s28, %s1982_s3  ;;  %p1988_p12 = scmp.lt.s32.totalorder %s1982_s3, %s1982_s3 }
 0x8b0   :  { %p1989_p13 = por %p1988_p12, %p1987_p11 }
 0x8b2   :  { %p1990_p0 = pnand %p1989_p13, %p1983_p10 }
 0x975   :  { %v1751_v6 = vpop.f32.mrb[6].mxu0 }
 0x976   :  { %1497 = vrot.lane.b32.xlu1 %v1751_v6, %s2017_s10  ;;  %v1480_v7 = vpop.f32.mrb[7].mxu0  ;;  %v1500_v10 = vrot.slane %v1751_v6, 4 }
 0x977   :  { %v1492_v8 = vrot.slane %v1480_v7, 4 }
 0x979   :  { %1493 = vrot.lane.b32.xlu0 %v1492_v8, %s2021_s14 }
 0x97d   :  { %1501 = vrot.lane.b32.xlu0 %v1500_v10, %s2016_s1 }
 0x9e8   :  { %v1498_v13 = vpop.permute.xlu1 %1497 }
 0x9eb   :  { %v1494_v11 = vpop.permute.xlu0 %1493 }
 0x9ec   :  { %v1504_v12 = vsel %vm55_vm0, %v1480_v7, %v1494_v11 }
 0x9ed   :  { %v1506_v14 = vsel %vm1505_vm10, %v1504_v12, %v1498_v13 }
 0x9ef   :  { %v1502_v16 = vpop.permute.xlu0 %1501 }
 0x9f0   :  { %v1508_v17 = vsel %vm1507_vm11, %v1506_v14, %v1502_v16 }
 0x9f1   :  { %1509 = vst [vmem:[#allocation7] sm:$0xf] %v1508_v17 }
 0x9f2   :  { %1993 = shalt.err (!%p1990_p0)
}
 0x9f3   :  { %s1994_s4 = scalar_lea.hbm %s2275_s2, 64 }
 0x9f4   :  { %p1995_p1 = scmp.ne.s32.totalorder %s2275_s2, %s1994_s4  ;;  %p1998_p2 = scmp.lt.u32.totalorder %s1994_s4, %s2275_s2 }
 0x9f6   :  { %p2000_p3 = pnand %p1998_p2, %p1995_p1 }
 0x9f8   :  { %2003 = shalt.err (!%p2000_p3)
}
 0x9f9   :  { %1522 = dma.vmem_to_hbm [thread:$0]  %s1520_s28, 64, %s2275_s2, [#allocation4]  }
 0x9fa   :  { %2008 = dma.done.wait [#allocation4], 64  }
 0x9fb   :  { %2009 = vsyncadd [#allocation4], 4294967232 }
 0x9fc   :  { %2010 = dma.done.wait [#allocation9], 128  }
 0x9fd   :  { %2011 = vsyncadd [#allocation9], 4294967168 }
 0x9fe   :  { %1539 = vsyncpa [#allocation3], 1 }
 0x9ff   :  { %1540 = vsyncpa [#allocation6], 1 }
 0xa00   :  { %1541 = vsyncpa [#allocation4], 1 }
 0xa01   :  { %1542 = vsyncpa [#allocation9], 1 }

</bundles_post_ra>
